<compile_context>
chip_gen: v6e
topology: v6e:2x2x1
jax: 0.10.0
libtpu: 0.0.40
codegen_flags: <defaults>
</compile_context>

<pallas_src>
import jax
import jax.numpy as jnp
from jax.experimental import pallas as pl
from jax.experimental.pallas import tpu as pltpu

BN_EPS = 1e-5


def _round_up(x, m):
    return (x + m - 1) // m * m


def _mlp_kernel(xu_ref, xg_ref, tu_ref, tg_ref, b1_ref,
                w2_ref, b2_ref, w3_ref, b3_ref, w4_ref, b4_ref,
                w5_ref, b5_ref, out_ref):
    """One batch tile: fused embedding-bag (one-hot-count matmul) + 5-layer MLP."""
    ids_u = xu_ref[...]                        # (TB, Lu) int32
    ids_g = xg_ref[...]                        # (TB, Lg) int32
    tb = ids_u.shape[0]

    def bag_counts(ids, vocab):
        # counts[b, v] = #occurrences of v in ids[b, :]  (small ints -> exact bf16)
        vid = jax.lax.broadcasted_iota(jnp.int32, (tb, vocab), 1)
        c = jnp.zeros((tb, vocab), jnp.float32)
        for l in range(ids.shape[1]):          # static unroll, L is tiny (3-4)
            c = c + (ids[:, l:l + 1] == vid).astype(jnp.float32)
        return c.astype(jnp.bfloat16)

    cu = bag_counts(ids_u, tu_ref.shape[0])    # (TB, Vu) bf16
    cg = bag_counts(ids_g, tg_ref.shape[0])    # (TB, Vg) bf16

    # Layer 1: embedding mean + BatchNorm(eval) + linear_1, pre-folded into
    # T_u / T_g / b1' by the wrapper. MXU dots, f32 accumulate.
    h = (jnp.dot(cu, tu_ref[...], preferred_element_type=jnp.float32)
         + jnp.dot(cg, tg_ref[...], preferred_element_type=jnp.float32)
         + b1_ref[...])
    h = jnp.maximum(h, 0.0)                    # relu (dropout == identity in eval)

    # Layers 2..4: bf16 MXU matmuls, f32 bias-add / relu.
    h = jnp.maximum(jnp.dot(h.astype(jnp.bfloat16), w2_ref[...],
                            preferred_element_type=jnp.float32) + b2_ref[...], 0.0)
    h = jnp.maximum(jnp.dot(h.astype(jnp.bfloat16), w3_ref[...],
                            preferred_element_type=jnp.float32) + b3_ref[...], 0.0)
    h = jnp.maximum(jnp.dot(h.astype(jnp.bfloat16), w4_ref[...],
                            preferred_element_type=jnp.float32) + b4_ref[...], 0.0)

    # Layer 5 (K=8, N=1): VPU broadcast-multiply + lane reduce (no 1-lane MXU op).
    z = jnp.sum(h * w5_ref[...], axis=-1, keepdims=True) + b5_ref[...]   # (TB, 1)
    out_ref[...] = jax.nn.sigmoid(z)


def mlp_forward(x_user, x_genre, params, *, block_batch=512):
    """x_user: (B, Lu) int32, x_genre: (B, Lg) int32 -> (B, 1) f32 probabilities."""
    B, Lu = x_user.shape
    _, Lg = x_genre.shape
    E = params["emb_user"].shape[1]

    # ---- fold eval BatchNorm + embedding mean + linear_1 (all linear) ----------
    s = params["bn_gamma"] * jax.lax.rsqrt(params["bn_var"] + BN_EPS)   # (1, 2E)
    t = params["bn_beta"] - params["bn_mean"] * s                        # (1, 2E)
    w1s = s.reshape(-1, 1) * params["w1"]                                # (2E, H1)
    b1p = (params["b1"] + t @ params["w1"]).astype(jnp.float32)          # (1, H1)
    t_u = ((params["emb_user"] @ w1s[:E]) / Lu).astype(jnp.bfloat16)     # (Vu, H1)
    t_g = ((params["emb_genre"] @ w1s[E:]) / Lg).astype(jnp.bfloat16)    # (Vg, H1)

    w2 = params["w2"].astype(jnp.bfloat16)
    w3 = params["w3"].astype(jnp.bfloat16)
    w4 = params["w4"].astype(jnp.bfloat16)
    w5 = params["w5"].reshape(1, -1).astype(jnp.float32)   # (1, 8), VPU tail layer
    b2 = params["b2"].astype(jnp.float32)
    b3 = params["b3"].astype(jnp.float32)
    b4 = params["b4"].astype(jnp.float32)
    b5 = params["b5"].astype(jnp.float32)

    # ---- batch tiling: 1-D grid, weights VMEM-resident across steps ------------
    tb = min(block_batch, _round_up(B, 8))     # tile rows, multiple of 8
    bp = _round_up(B, tb)
    if bp != B:
        pad = ((0, bp - B), (0, 0))
        x_user = jnp.pad(x_user, pad)          # pad rows use index 0 (sliced off)
        x_genre = jnp.pad(x_genre, pad)

    kernel_args = (x_user.astype(jnp.int32), x_genre.astype(jnp.int32),
                   t_u, t_g, b1p, w2, b2, w3, b3, w4, b4, w5, b5)

    batch_row = lambda i: (i, 0)
    const = lambda i: (0, 0)
    in_specs = [
        pl.BlockSpec((tb, Lu), batch_row),
        pl.BlockSpec((tb, Lg), batch_row),
    ] + [pl.BlockSpec(a.shape, const) for a in kernel_args[2:]]

    out = pl.pallas_call(
        _mlp_kernel,
        out_shape=jax.ShapeDtypeStruct((bp, 1), jnp.float32),
        grid=(bp // tb,),
        in_specs=in_specs,
        out_specs=pl.BlockSpec((tb, 1), batch_row),
        compiler_params=pltpu.CompilerParams(
            dimension_semantics=("parallel",),   # megacore sharding of batch tiles
            vmem_limit_bytes=32 << 20,           # weights ~40 KiB + small tiles
        ),
    )(*kernel_args)

    return out[:B]


def mlp_reference(x_user, x_genre, params):
    """Pure-JAX reference (mirrors the PyTorch eval-mode forward)."""
    u = jnp.take(params["emb_user"], x_user, axis=0).mean(axis=1)
    g = jnp.take(params["emb_genre"], x_genre, axis=0).mean(axis=1)
    f = jnp.concatenate([u, g], axis=1)
    s = params["bn_gamma"] * jax.lax.rsqrt(params["bn_var"] + BN_EPS)
    f = (f - params["bn_mean"]) * s + params["bn_beta"]
    h = jax.nn.relu(f @ params["w1"] + params["b1"])
    h = jax.nn.relu(h @ params["w2"] + params["b2"])
    h = jax.nn.relu(h @ params["w3"] + params["b3"])
    h = jax.nn.relu(h @ params["w4"] + params["b4"])
    return jax.nn.sigmoid(h @ params["w5"] + params["b5"])


def init_params(key, user_dict_size, genre_dict_size, embed_dim,
                hidden_1=128, hidden_2=64, hidden_3=32, hidden_4=8, hidden_5=1):
    feature_num = embed_dim * 2
    ks = jax.random.split(key, 12)

    def linear(kw, kb, fan_in, fan_out):
        bound = 1.0 / jnp.sqrt(fan_in)
        w = jax.random.uniform(kw, (fan_in, fan_out), jnp.float32, -bound, bound)
        b = jax.random.uniform(kb, (1, fan_out), jnp.float32, -bound, bound)
        return w, b

    w1, b1 = linear(ks[2], ks[3], feature_num, hidden_1)
    w2, b2 = linear(ks[4], ks[5], hidden_1, hidden_2)
    w3, b3 = linear(ks[6], ks[7], hidden_2, hidden_3)
    w4, b4 = linear(ks[8], ks[9], hidden_3, hidden_4)
    w5, b5 = linear(ks[10], ks[11], hidden_4, hidden_5)

    return {
        "emb_user": jax.random.normal(ks[0], (user_dict_size, embed_dim), jnp.float32),
        "emb_genre": jax.random.normal(ks[1], (genre_dict_size, embed_dim), jnp.float32),
        "bn_gamma": jnp.ones((1, feature_num), jnp.float32),
        "bn_beta": jnp.zeros((1, feature_num), jnp.float32),
        "bn_mean": jnp.zeros((1, feature_num), jnp.float32),
        "bn_var": jnp.ones((1, feature_num), jnp.float32),
        "w1": w1, "b1": b1, "w2": w2, "b2": b2, "w3": w3, "b3": b3,
        "w4": w4, "b4": b4, "w5": w5, "b5": b5,
    }


if __name__ == "__main__":
    USER_DICT, GENRE_DICT, EMBED_DIM = 50, 20, 16
    B, LU, LG = 8, 4, 3

    key = jax.random.PRNGKey(0)
    k_params, k_u, k_g = jax.random.split(key, 3)

    params = init_params(k_params, USER_DICT, GENRE_DICT, EMBED_DIM)
    x_user = jax.random.randint(k_u, (B, LU), 0, USER_DICT, dtype=jnp.int32)
    x_genre = jax.random.randint(k_g, (B, LG), 0, GENRE_DICT, dtype=jnp.int32)

    out = mlp_forward(x_user, x_genre, params)
    jax.block_until_ready(out)
    assert out.shape == (B, 1) and out.dtype == jnp.float32

    ref = mlp_reference(x_user, x_genre, params)
    assert float(jnp.max(jnp.abs(out - ref))) < 3e-2, "mismatch vs. pure-JAX reference"

    print("KERNEL_OK")
</pallas_src>

<mosaic_0001>
module attributes {stable_mosaic.version = 11 : i64} {
  func.func @_mlp_kernel(%arg0: i32, %arg1: memref<8x4xi32, #tpu.memory_space<vmem>>, %arg2: memref<8x3xi32, #tpu.memory_space<vmem>>, %arg3: memref<50x128xbf16, #tpu.memory_space<vmem>>, %arg4: memref<20x128xbf16, #tpu.memory_space<vmem>>, %arg5: memref<1x128xf32, #tpu.memory_space<vmem>>, %arg6: memref<128x64xbf16, #tpu.memory_space<vmem>>, %arg7: memref<1x64xf32, #tpu.memory_space<vmem>>, %arg8: memref<64x32xbf16, #tpu.memory_space<vmem>>, %arg9: memref<1x32xf32, #tpu.memory_space<vmem>>, %arg10: memref<32x8xbf16, #tpu.memory_space<vmem>>, %arg11: memref<1x8xf32, #tpu.memory_space<vmem>>, %arg12: memref<1x8xf32, #tpu.memory_space<vmem>>, %arg13: memref<1x1xf32, #tpu.memory_space<vmem>>, %arg14: memref<8x1xf32, #tpu.memory_space<vmem>>) attributes {dimension_semantics = [#tpu.dimension_semantics<parallel>], iteration_bounds = array<i64: 1>, scalar_prefetch = 0 : i64, scratch_operands = 0 : i64, tpu.core_type = #tpu.core_type<tc>, window_params = [{transform_indices = @transform_0, window_bounds = array<i64: 8, 4>}, {transform_indices = @transform_1, window_bounds = array<i64: 8, 3>}, {pipeline_mode = #tpu.pipeline_mode<synchronous>, transform_indices = @transform_2, window_bounds = array<i64: 50, 128>}, {pipeline_mode = #tpu.pipeline_mode<synchronous>, transform_indices = @transform_3, window_bounds = array<i64: 20, 128>}, {pipeline_mode = #tpu.pipeline_mode<synchronous>, transform_indices = @transform_4, window_bounds = array<i64: 1, 128>}, {pipeline_mode = #tpu.pipeline_mode<synchronous>, transform_indices = @transform_5, window_bounds = array<i64: 128, 64>}, {pipeline_mode = #tpu.pipeline_mode<synchronous>, transform_indices = @transform_6, window_bounds = array<i64: 1, 64>}, {pipeline_mode = #tpu.pipeline_mode<synchronous>, transform_indices = @transform_7, window_bounds = array<i64: 64, 32>}, {pipeline_mode = #tpu.pipeline_mode<synchronous>, transform_indices = @transform_8, window_bounds = array<i64: 1, 32>}, {pipeline_mode = #tpu.pipeline_mode<synchronous>, transform_indices = @transform_9, window_bounds = array<i64: 32, 8>}, {pipeline_mode = #tpu.pipeline_mode<synchronous>, transform_indices = @transform_10, window_bounds = array<i64: 1, 8>}, {pipeline_mode = #tpu.pipeline_mode<synchronous>, transform_indices = @transform_11, window_bounds = array<i64: 1, 8>}, {pipeline_mode = #tpu.pipeline_mode<synchronous>, transform_indices = @transform_12, window_bounds = array<i64: 1, 1>}, {transform_indices = @transform_13, window_bounds = array<i64: 8, 1>}]} {
    %c0 = arith.constant 0 : index
    %c0_0 = arith.constant 0 : index
    %0 = vector.load %arg1[%c0, %c0_0] : memref<8x4xi32, #tpu.memory_space<vmem>>, vector<8x4xi32>
    %c0_1 = arith.constant 0 : index
    %c0_2 = arith.constant 0 : index
    %1 = vector.load %arg2[%c0_1, %c0_2] : memref<8x3xi32, #tpu.memory_space<vmem>>, vector<8x3xi32>
    %2 = tpu.iota {dimensions = array<i32: 1>} : vector<8x50xi32>
    %cst = arith.constant 0.000000e+00 : f32
    %3 = vector.broadcast %cst : f32 to vector<8x50xf32>
    %4 = vector.extract_strided_slice %0 {offsets = [0, 0], sizes = [8, 1], strides = [1, 1]} : vector<8x4xi32> to vector<8x1xi32>
    %5 = vector.broadcast %4 : vector<8x1xi32> to vector<8x50xi32>
    %6 = arith.cmpi eq, %5, %2 : vector<8x50xi32>
    %7 = arith.extui %6 : vector<8x50xi1> to vector<8x50xi32>
    %8 = arith.sitofp %7 : vector<8x50xi32> to vector<8x50xf32>
    %9 = arith.addf %3, %8 : vector<8x50xf32>
    %10 = vector.extract_strided_slice %0 {offsets = [0, 1], sizes = [8, 1], strides = [1, 1]} : vector<8x4xi32> to vector<8x1xi32>
    %11 = vector.broadcast %10 : vector<8x1xi32> to vector<8x50xi32>
    %12 = arith.cmpi eq, %11, %2 : vector<8x50xi32>
    %13 = arith.extui %12 : vector<8x50xi1> to vector<8x50xi32>
    %14 = arith.sitofp %13 : vector<8x50xi32> to vector<8x50xf32>
    %15 = arith.addf %9, %14 : vector<8x50xf32>
    %16 = vector.extract_strided_slice %0 {offsets = [0, 2], sizes = [8, 1], strides = [1, 1]} : vector<8x4xi32> to vector<8x1xi32>
    %17 = vector.broadcast %16 : vector<8x1xi32> to vector<8x50xi32>
    %18 = arith.cmpi eq, %17, %2 : vector<8x50xi32>
    %19 = arith.extui %18 : vector<8x50xi1> to vector<8x50xi32>
    %20 = arith.sitofp %19 : vector<8x50xi32> to vector<8x50xf32>
    %21 = arith.addf %15, %20 : vector<8x50xf32>
    %22 = vector.extract_strided_slice %0 {offsets = [0, 3], sizes = [8, 1], strides = [1, 1]} : vector<8x4xi32> to vector<8x1xi32>
    %23 = vector.broadcast %22 : vector<8x1xi32> to vector<8x50xi32>
    %24 = arith.cmpi eq, %23, %2 : vector<8x50xi32>
    %25 = arith.extui %24 : vector<8x50xi1> to vector<8x50xi32>
    %26 = arith.sitofp %25 : vector<8x50xi32> to vector<8x50xf32>
    %27 = arith.addf %21, %26 : vector<8x50xf32>
    %28 = arith.truncf %27 : vector<8x50xf32> to vector<8x50xbf16>
    %29 = tpu.iota {dimensions = array<i32: 1>} : vector<8x20xi32>
    %cst_3 = arith.constant 0.000000e+00 : f32
    %30 = vector.broadcast %cst_3 : f32 to vector<8x20xf32>
    %31 = vector.extract_strided_slice %1 {offsets = [0, 0], sizes = [8, 1], strides = [1, 1]} : vector<8x3xi32> to vector<8x1xi32>
    %32 = vector.broadcast %31 : vector<8x1xi32> to vector<8x20xi32>
    %33 = arith.cmpi eq, %32, %29 : vector<8x20xi32>
    %34 = arith.extui %33 : vector<8x20xi1> to vector<8x20xi32>
    %35 = arith.sitofp %34 : vector<8x20xi32> to vector<8x20xf32>
    %36 = arith.addf %30, %35 : vector<8x20xf32>
    %37 = vector.extract_strided_slice %1 {offsets = [0, 1], sizes = [8, 1], strides = [1, 1]} : vector<8x3xi32> to vector<8x1xi32>
    %38 = vector.broadcast %37 : vector<8x1xi32> to vector<8x20xi32>
    %39 = arith.cmpi eq, %38, %29 : vector<8x20xi32>
    %40 = arith.extui %39 : vector<8x20xi1> to vector<8x20xi32>
    %41 = arith.sitofp %40 : vector<8x20xi32> to vector<8x20xf32>
    %42 = arith.addf %36, %41 : vector<8x20xf32>
    %43 = vector.extract_strided_slice %1 {offsets = [0, 2], sizes = [8, 1], strides = [1, 1]} : vector<8x3xi32> to vector<8x1xi32>
    %44 = vector.broadcast %43 : vector<8x1xi32> to vector<8x20xi32>
    %45 = arith.cmpi eq, %44, %29 : vector<8x20xi32>
    %46 = arith.extui %45 : vector<8x20xi1> to vector<8x20xi32>
    %47 = arith.sitofp %46 : vector<8x20xi32> to vector<8x20xf32>
    %48 = arith.addf %42, %47 : vector<8x20xf32>
    %49 = arith.truncf %48 : vector<8x20xf32> to vector<8x20xbf16>
    %c0_4 = arith.constant 0 : index
    %c0_5 = arith.constant 0 : index
    %50 = vector.load %arg3[%c0_4, %c0_5] : memref<50x128xbf16, #tpu.memory_space<vmem>>, vector<50x128xbf16>
    %cst_6 = arith.constant dense<0.000000e+00> : vector<8x128xf32>
    %51 = tpu.matmul %28, %50, %cst_6 {dimension_numbers = #tpu.dot_dimension_numbers<[1], [0], [0], [1], [0, 0, 1, 1], [], []>} : vector<8x50xbf16>, vector<50x128xbf16>, vector<8x128xf32> -> vector<8x128xf32>
    %c0_7 = arith.constant 0 : index
    %c0_8 = arith.constant 0 : index
    %52 = vector.load %arg4[%c0_7, %c0_8] : memref<20x128xbf16, #tpu.memory_space<vmem>>, vector<20x128xbf16>
    %cst_9 = arith.constant dense<0.000000e+00> : vector<8x128xf32>
    %53 = tpu.matmul %49, %52, %cst_9 {dimension_numbers = #tpu.dot_dimension_numbers<[1], [0], [0], [1], [0, 0, 1, 1], [], []>} : vector<8x20xbf16>, vector<20x128xbf16>, vector<8x128xf32> -> vector<8x128xf32>
    %54 = arith.addf %51, %53 : vector<8x128xf32>
    %c0_10 = arith.constant 0 : index
    %c0_11 = arith.constant 0 : index
    %55 = vector.load %arg5[%c0_10, %c0_11] : memref<1x128xf32, #tpu.memory_space<vmem>>, vector<1x128xf32>
    %56 = vector.broadcast %55 : vector<1x128xf32> to vector<8x128xf32>
    %57 = arith.addf %54, %56 : vector<8x128xf32>
    %cst_12 = arith.constant 0.000000e+00 : f32
    %58 = vector.broadcast %cst_12 : f32 to vector<8x128xf32>
    %59 = arith.maximumf %57, %58 : vector<8x128xf32>
    %60 = arith.truncf %59 : vector<8x128xf32> to vector<8x128xbf16>
    %c0_13 = arith.constant 0 : index
    %c0_14 = arith.constant 0 : index
    %61 = vector.load %arg6[%c0_13, %c0_14] : memref<128x64xbf16, #tpu.memory_space<vmem>>, vector<128x64xbf16>
    %cst_15 = arith.constant dense<0.000000e+00> : vector<8x64xf32>
    %62 = tpu.matmul %60, %61, %cst_15 {dimension_numbers = #tpu.dot_dimension_numbers<[1], [0], [0], [1], [0, 0, 1, 1], [], []>} : vector<8x128xbf16>, vector<128x64xbf16>, vector<8x64xf32> -> vector<8x64xf32>
    %c0_16 = arith.constant 0 : index
    %c0_17 = arith.constant 0 : index
    %63 = vector.load %arg7[%c0_16, %c0_17] : memref<1x64xf32, #tpu.memory_space<vmem>>, vector<1x64xf32>
    %64 = vector.broadcast %63 : vector<1x64xf32> to vector<8x64xf32>
    %65 = arith.addf %62, %64 : vector<8x64xf32>
    %cst_18 = arith.constant 0.000000e+00 : f32
    %66 = vector.broadcast %cst_18 : f32 to vector<8x64xf32>
    %67 = arith.maximumf %65, %66 : vector<8x64xf32>
    %68 = arith.truncf %67 : vector<8x64xf32> to vector<8x64xbf16>
    %c0_19 = arith.constant 0 : index
    %c0_20 = arith.constant 0 : index
    %69 = vector.load %arg8[%c0_19, %c0_20] : memref<64x32xbf16, #tpu.memory_space<vmem>>, vector<64x32xbf16>
    %cst_21 = arith.constant dense<0.000000e+00> : vector<8x32xf32>
    %70 = tpu.matmul %68, %69, %cst_21 {dimension_numbers = #tpu.dot_dimension_numbers<[1], [0], [0], [1], [0, 0, 1, 1], [], []>} : vector<8x64xbf16>, vector<64x32xbf16>, vector<8x32xf32> -> vector<8x32xf32>
    %c0_22 = arith.constant 0 : index
    %c0_23 = arith.constant 0 : index
    %71 = vector.load %arg9[%c0_22, %c0_23] : memref<1x32xf32, #tpu.memory_space<vmem>>, vector<1x32xf32>
    %72 = vector.broadcast %71 : vector<1x32xf32> to vector<8x32xf32>
    %73 = arith.addf %70, %72 : vector<8x32xf32>
    %cst_24 = arith.constant 0.000000e+00 : f32
    %74 = vector.broadcast %cst_24 : f32 to vector<8x32xf32>
    %75 = arith.maximumf %73, %74 : vector<8x32xf32>
    %76 = arith.truncf %75 : vector<8x32xf32> to vector<8x32xbf16>
    %c0_25 = arith.constant 0 : index
    %c0_26 = arith.constant 0 : index
    %77 = vector.load %arg10[%c0_25, %c0_26] : memref<32x8xbf16, #tpu.memory_space<vmem>>, vector<32x8xbf16>
    %cst_27 = arith.constant dense<0.000000e+00> : vector<8x8xf32>
    %78 = tpu.matmul %76, %77, %cst_27 {dimension_numbers = #tpu.dot_dimension_numbers<[1], [0], [0], [1], [0, 0, 1, 1], [], []>} : vector<8x32xbf16>, vector<32x8xbf16>, vector<8x8xf32> -> vector<8x8xf32>
    %c0_28 = arith.constant 0 : index
    %c0_29 = arith.constant 0 : index
    %79 = vector.load %arg11[%c0_28, %c0_29] : memref<1x8xf32, #tpu.memory_space<vmem>>, vector<1x8xf32>
    %80 = vector.broadcast %79 : vector<1x8xf32> to vector<8x8xf32>
    %81 = arith.addf %78, %80 : vector<8x8xf32>
    %cst_30 = arith.constant 0.000000e+00 : f32
    %82 = vector.broadcast %cst_30 : f32 to vector<8x8xf32>
    %83 = arith.maximumf %81, %82 : vector<8x8xf32>
    %c0_31 = arith.constant 0 : index
    %c0_32 = arith.constant 0 : index
    %84 = vector.load %arg12[%c0_31, %c0_32] : memref<1x8xf32, #tpu.memory_space<vmem>>, vector<1x8xf32>
    %85 = vector.broadcast %84 : vector<1x8xf32> to vector<8x8xf32>
    %86 = arith.mulf %83, %85 : vector<8x8xf32>
    %cst_33 = arith.constant dense<0.000000e+00> : vector<8xf32>
    %87 = vector.multi_reduction <add>, %86, %cst_33 [1] : vector<8x8xf32> to vector<8xf32>
    %88 = vector.shape_cast %87 : vector<8xf32> to vector<8x1xf32>
    %c0_34 = arith.constant 0 : index
    %c0_35 = arith.constant 0 : index
    %89 = vector.load %arg13[%c0_34, %c0_35] : memref<1x1xf32, #tpu.memory_space<vmem>>, vector<1x1xf32>
    %90 = vector.broadcast %89 : vector<1x1xf32> to vector<8x1xf32>
    %91 = arith.addf %88, %90 : vector<8x1xf32>
    %92 = arith.negf %91 : vector<8x1xf32>
    %93 = math.exp %92 : vector<8x1xf32>
    %cst_36 = arith.constant 1.000000e+00 : f32
    %94 = vector.broadcast %cst_36 : f32 to vector<8x1xf32>
    %95 = arith.addf %94, %93 : vector<8x1xf32>
    %96 = arith.divf %94, %95 : vector<8x1xf32>
    %c0_37 = arith.constant 0 : index
    %c0_38 = arith.constant 0 : index
    %97 = vector.load %arg14[%c0_37, %c0_38] : memref<8x1xf32, #tpu.memory_space<vmem>>, vector<8x1xf32>
    tpu.vector_store %arg14[%c0_37, %c0_38], %96 {strides = array<i32>} : memref<8x1xf32, #tpu.memory_space<vmem>>, vector<8x1xf32>,
    return
  }
  func.func @transform_0(%arg0: i32) -> (i32, i32) {
    %c0_i32 = arith.constant 0 : i32
    %c0_i32_0 = arith.constant 0 : i32
    return %arg0, %c0_i32 : i32, i32
  }
  func.func @transform_1(%arg0: i32) -> (i32, i32) {
    %c0_i32 = arith.constant 0 : i32
    %c0_i32_0 = arith.constant 0 : i32
    return %arg0, %c0_i32 : i32, i32
  }
  func.func @transform_2(%arg0: i32) -> (i32, i32) {
    %c0_i32 = arith.constant 0 : i32
    %c0_i32_0 = arith.constant 0 : i32
    %c0_i32_1 = arith.constant 0 : i32
    return %c0_i32, %c0_i32_0 : i32, i32
  }
  func.func @transform_3(%arg0: i32) -> (i32, i32) {
    %c0_i32 = arith.constant 0 : i32
    %c0_i32_0 = arith.constant 0 : i32
    %c0_i32_1 = arith.constant 0 : i32
    return %c0_i32, %c0_i32_0 : i32, i32
  }
  func.func @transform_4(%arg0: i32) -> (i32, i32) {
    %c0_i32 = arith.constant 0 : i32
    %c0_i32_0 = arith.constant 0 : i32
    %c0_i32_1 = arith.constant 0 : i32
    return %c0_i32, %c0_i32_0 : i32, i32
  }
  func.func @transform_5(%arg0: i32) -> (i32, i32) {
    %c0_i32 = arith.constant 0 : i32
    %c0_i32_0 = arith.constant 0 : i32
    %c0_i32_1 = arith.constant 0 : i32
    return %c0_i32, %c0_i32_0 : i32, i32
  }
  func.func @transform_6(%arg0: i32) -> (i32, i32) {
    %c0_i32 = arith.constant 0 : i32
    %c0_i32_0 = arith.constant 0 : i32
    %c0_i32_1 = arith.constant 0 : i32
    return %c0_i32, %c0_i32_0 : i32, i32
  }
  func.func @transform_7(%arg0: i32) -> (i32, i32) {
    %c0_i32 = arith.constant 0 : i32
    %c0_i32_0 = arith.constant 0 : i32
    %c0_i32_1 = arith.constant 0 : i32
    return %c0_i32, %c0_i32_0 : i32, i32
  }
  func.func @transform_8(%arg0: i32) -> (i32, i32) {
    %c0_i32 = arith.constant 0 : i32
    %c0_i32_0 = arith.constant 0 : i32
    %c0_i32_1 = arith.constant 0 : i32
    return %c0_i32, %c0_i32_0 : i32, i32
  }
  func.func @transform_9(%arg0: i32) -> (i32, i32) {
    %c0_i32 = arith.constant 0 : i32
    %c0_i32_0 = arith.constant 0 : i32
    %c0_i32_1 = arith.constant 0 : i32
    return %c0_i32, %c0_i32_0 : i32, i32
  }
  func.func @transform_10(%arg0: i32) -> (i32, i32) {
    %c0_i32 = arith.constant 0 : i32
    %c0_i32_0 = arith.constant 0 : i32
    %c0_i32_1 = arith.constant 0 : i32
    return %c0_i32, %c0_i32_0 : i32, i32
  }
  func.func @transform_11(%arg0: i32) -> (i32, i32) {
    %c0_i32 = arith.constant 0 : i32
    %c0_i32_0 = arith.constant 0 : i32
    %c0_i32_1 = arith.constant 0 : i32
    return %c0_i32, %c0_i32_0 : i32, i32
  }
  func.func @transform_12(%arg0: i32) -> (i32, i32) {
    %c0_i32 = arith.constant 0 : i32
    %c0_i32_0 = arith.constant 0 : i32
    %c0_i32_1 = arith.constant 0 : i32
    return %c0_i32, %c0_i32_0 : i32, i32
  }
  func.func @transform_13(%arg0: i32) -> (i32, i32) {
    %c0_i32 = arith.constant 0 : i32
    %c0_i32_0 = arith.constant 0 : i32
    return %arg0, %c0_i32 : i32, i32
  }
}

</mosaic_0001>

<bundles_post_ra>
// kernel: tpu_custom_call.1
= control target key start
LH: loop header
LB: loop body
LE: loop exit
PB: predicated region body
PF: predicated region fallthrough
CT: control target
= control target key end

     0   :  { %v707_v0 = vmov 2   ;;  %v708_v1 = vmov 0   ;;  %vm194_vm0 = vcmask 1040384   ;;  %v709_v4 = vmov 0.0   ;;  %s907_s0 = inlined_call_operand.vmem [shape: s32[8,4], index: 0, kind: input, shape index: {}]   ;;  %s908_s2 = inlined_call_operand.vmem [shape: bf16[50,128], index: 2, kind: input, shape index: {}]   ;;  %s909_s1 = inlined_call_operand.vmem [shape: s32[8,3], index: 1, kind: input, shape index: {}]   ;;  %s910_s3 = inlined_call_operand.vmem [shape: bf16[20,128], index: 3, kind: input, shape index: {}]   ;;  %s911_s5 = inlined_call_operand.vmem [shape: bf16[128,64], index: 5, kind: input, shape index: {}]   ;;  %s912_s7 = inlined_call_operand.vmem [shape: bf16[64,32], index: 7, kind: input, shape index: {}]   ;;  %s913_s4 = inlined_call_operand.vmem [shape: f32[1,128], index: 4, kind: input, shape index: {}]   ;;  %s914_s9 = inlined_call_operand.vmem [shape: bf16[32,8], index: 9, kind: input, shape index: {}]   ;;  %s915_s6 = inlined_call_operand.vmem [shape: f32[1,64], index: 6, kind: input, shape index: {}]   ;;  %s916_s8 = inlined_call_operand.vmem [shape: f32[1,32], index: 8, kind: input, shape index: {}]   ;;  %s917_s12 = inlined_call_operand.<no memory space> [shape: f32[1,1], index: 12, kind: input, shape index: {}]   ;;  %s918_s10 = inlined_call_operand.vmem [shape: f32[1,8], index: 10, kind: input, shape index: {}]   ;;  %s919_s11 = inlined_call_operand.vmem [shape: f32[1,8], index: 11, kind: input, shape index: {}]   ;;  %s920_s13 = inlined_call_operand.vmem [shape: f32[8,1], index: 13, kind: output, shape index: {}]  }
   0x1   :  { %677 = vset.pattern.permute.xlu1 %v707_v0  ;;  %675 = vset.pattern.permute.xlu0 %v708_v1  ;;  %v47_v2 = vld [vmem:[%s907_s0] sm:$0xff]  ;;  %v683_v3 = vld [vmem:[%s908_s2 + $0x18] ss:$0 sps:$4 sm:$0x11]   ;;  %v684_v7 = vld [vmem:[%s908_s2 + $0x10] sm:$0xff]   ;;  %v710_v8 = vmov 1   ;;  %v49_v15 = vlaneseq }
   0x2   :  { %66 = vperm.xlu1 %677, %v47_v2   ;;  %52 = vperm.xlu0 %675, %v47_v2   ;;  %v48_v5 = vld [vmem:[%s909_s1] sm:$0xff]  ;;  %v196_v6 = vsel %vm194_vm0, %v683_v3, 0  ;;  %v685_v9 = vld [vmem:[%s908_s2 + $0x8] sm:$0xff]   ;;  %vm125_vm1 = vcmask 1041408   ;;  %v711_v11 = vmov 3   ;;  %vm712_vm2 = vmmov 0  }
   0x3   :  { %617 = vmatprep.subr.bf16.mxu1 %v709_v4  ;;  %609 = vmatprep.subr.bf16.mxu0 %v709_v4  ;;  %v687_v10 = vld [vmem:[%s910_s3 + $0x8] ss:$0 sps:$4 sm:$0x33]   ;;  %v686_v13 = vld [vmem:[%s908_s2] sm:$0xff]   ;;  %v50_v16 = vand.u32 127, %v49_v15  ;;  %vm190_vm9 = vcmask 408576  }
   0x4   :  { %618 = vmatpush3.bf16.msra.mxu1 %v196_v6  ;;  %v127_v12 = vsel %vm125_vm1, %v687_v10, 0  ;;  %625 = vmatprep.mubr.msk.bf16.mxu1 %vm712_vm2, %v709_v4  ;;  %v688_v14 = vld [vmem:[%s910_s3] sm:$0xff]   ;;  %vm121_vm11 = vcmask 162816   ;;  %v689_v37 = vld [vmem:[%s911_s5 + $0x38] sm:$0xff]   ;;  %v690_v39 = vld [vmem:[%s911_s5 + $0x30] sm:$0xff]   ;;  %vm400_vm12 = vcmask 523264  }
   0x5   :  { %619 = vmatprep.subr.bf16.mxu1 %v709_v4  ;;  %610 = vmatpush3.bf16.msra.mxu0 %v127_v12  ;;  %v691_v40 = vld [vmem:[%s911_s5 + $0x28] sm:$0xff]   ;;  %v692_v41 = vld [vmem:[%s911_s5 + $0x20] sm:$0xff]   ;;  %v693_v42 = vld [vmem:[%s911_s5 + $0x18] sm:$0xff]   ;;  %vm469_vm13 = vcmask 261120   ;;  %vm522_vm14 = vcmask 64512   ;;  %vm540_vm15 = vcmask 7168  }
   0x6   :  { %678 = vset.pattern.permute.xlu1 %v708_v1  ;;  %676 = vset.pattern.permute.xlu0 %v710_v8  ;;  %v694_v43 = vld [vmem:[%s911_s5 + $0x10] sm:$0xff]   ;;  %v695_v44 = vld [vmem:[%s911_s5 + $0x8] sm:$0xff]   ;;  %v696_v45 = vld [vmem:[%s911_s5] sm:$0xff]  }
   0x7   :  { %81 = vperm.xlu1 %678, %v48_v5   ;;  %59 = vperm.xlu0 %676, %v47_v2   ;;  %v697_v46 = vld [vmem:[%s912_s7 + $0x18] sm:$0xff]   ;;  %v698_v47 = vld [vmem:[%s912_s7 + $0x10] sm:$0xff]   ;;  %v561_v52 = vld [vmem:[%s913_s4] ss:$0 sm:$0xff] }
   0x8   :  { %620 = vmatpush3.bf16.msra.mxu1 %v684_v7  ;;  %611 = vmatprep.subr.bf16.mxu0 %v709_v4  ;;  %v699_v61 = vld [vmem:[%s912_s7 + $0x8] sm:$0xff]   ;;  %v700_v62 = vld [vmem:[%s912_s7] sm:$0xff]  }
   0x9   :  { %621 = vmatprep.subr.bf16.mxu1 %v709_v4  ;;  %613 = vmatprep.mubr.msk.bf16.mxu0 %vm712_vm2, %v709_v4  ;;  %v562_v63 = vld [vmem:[%s915_s6] ss:$0 sm:$0xff]  ;;  %v701_v6 = vld [vmem:[%s914_s9 + $0x8] sm:$0xff]  }
   0xa   :  { %612 = vmatpush3.bf16.msra.mxu0 %v688_v14  ;;  %v571_v10 = vld [vmem:[%s916_s8] ss:$0 sm:$0xff] }
   0xb   :  { %679 = vset.pattern.permute.xlu1 %v710_v8  ;;  %680 = vset.pattern.permute.xlu0 %v711_v11 }
   0xc   :  { %88 = vperm.xlu1 %679, %v48_v5   ;;  %73 = vperm.xlu0 %680, %v47_v2  }
   0xd   :  { %622 = vmatpush3.bf16.msra.mxu1 %v685_v9  ;;  %629 = vmatprep.subr.bf16.mxu0 %v709_v4  ;;  %v702_v9 = vld [vmem:[%s914_s9] sm:$0xff]  }
   0xe   :  { %623 = vmatprep.subr.bf16.mxu1 %v709_v4 }
  0x10   :  { %681 = vset.pattern.permute.xlu1 %v707_v0  ;;  %682 = vset.pattern.permute.xlu0 %v707_v0 }
  0x11   :  { %95 = vperm.xlu1 %681, %v48_v5   ;;  %624 = vmatpush3.bf16.msra.mxu1 %v686_v13 }
  0x12   :  { %649 = vmatprep.subr.bf16.mxu1 %v709_v4 }
  0x7d   :  { %v67_v17 = vpop.permute.xlu1 %66  ;;  %v53_v18 = vpop.permute.xlu0 %52 }
  0x7e   :  { %vm54_vm3 = vcmp.eq.s32.totalorder %v53_v18, %v50_v16  ;;  %vm68_vm4 = vcmp.eq.s32.totalorder %v67_v17, %v50_v16  ;;  %v577_v18 = vld [vmem:[%s918_s10] ss:$0 sm:$0xff] }
  0x7f   :  { %v546_v19 = vsel %vm54_vm3, 1.0, %v709_v4  ;;  %v548_v24 = vsel %vm68_vm4, 1.0, %v709_v4 }
  0x82   :  { %v82_v20 = vpop.permute.xlu1 %81  ;;  %v60_v21 = vpop.permute.xlu0 %59 }
  0x83   :  { %vm61_vm5 = vcmp.eq.s32.totalorder %v60_v21, %v50_v16  ;;  %vm83_vm8 = vcmp.eq.s32.totalorder %v82_v20, %v50_v16 }
  0x84   :  { %v547_v22 = vsel %vm61_vm5, 1.0, %v709_v4  ;;  %v550_v31 = vsel %vm83_vm8, 1.0, %v709_v4 }
  0x85   :  { %v64_v23 = vadd.f32 %v547_v22, %v546_v19  ;;  %v581_v22 = vld [vmem:[%s919_s11] ss:$0 sm:$0xff] }
  0x87   :  { %v89_v25 = vpop.permute.xlu1 %88  ;;  %v71_v26 = vadd.f32 %v548_v24, %v64_v23  ;;  %v74_v27 = vpop.permute.xlu0 %73 }
  0x88   :  { %vm90_vm6 = vcmp.eq.s32.totalorder %v89_v25, %v50_v16  ;;  %vm75_vm7 = vcmp.eq.s32.totalorder %v74_v27, %v50_v16 }
  0x89   :  { %v549_v28 = vsel %vm75_vm7, 1.0, %v709_v4  ;;  %v551_v29 = vsel %vm90_vm6, 1.0, %v709_v4 }
  0x8a   :  { %v78_v30 = vadd.f32 %v549_v28, %v71_v26  ;;  %v93_v34 = vadd.f32 %v551_v29, %v550_v31 }
  0x8c   :  { %v79_v32 = vpack.c.bf16 %v78_v30, %v78_v30  ;;  %v96_v33 = vpop.permute.xlu1 %95 }
  0x8d   :  { %vm97_vm10 = vcmp.eq.s32.totalorder %v96_v33, %v50_v16 }
  0x8e   :  { %v552_v35 = vsel %vm97_vm10, 1.0, %v709_v4  ;;  %626 = vmatmul.mubr.msk.bf16.vlgmr.msra.gmra.mxu1 %vm190_vm9, %v79_v32 }
  0x8f   :  { %v100_v36 = vadd.f32 %v552_v35, %v93_v34  ;;  %657 = vmatprep.mubr.msk.bf16.mxu1 %vm712_vm2, %v709_v4  ;;  %650 = vmatpush3.bf16.msra.mxu1 %v697_v46 }
  0x90   :  { %651 = vmatprep.subr.bf16.mxu1 %v709_v4 }
  0x91   :  { %v101_v38 = vpack.c.bf16 %v100_v36, %v100_v36 }
  0x93   :  { %614 = vmatmul.mubr.msk.bf16.vlgmr.msra.gmra.mxu0 %vm121_vm11, %v101_v38  ;;  %652 = vmatpush3.bf16.msra.mxu1 %v698_v47 }
  0x94   :  { %630 = vmatpush3.bf16.msra.mxu0 %v689_v37  ;;  %645 = vmatprep.mubr.msk.bf16.mxu0 %vm712_vm2, %v709_v4 }
  0x95   :  { %631 = vmatprep.subr.bf16.mxu0 %v709_v4  ;;  %653 = vmatprep.subr.bf16.mxu1 %v709_v4 }
  0x97   :  { %654 = vmatpush3.bf16.msra.mxu1 %v699_v61 }
  0x98   :  { %632 = vmatpush3.bf16.msra.mxu0 %v690_v39  ;;  %655 = vmatprep.subr.bf16.mxu1 %v709_v4 }
  0x99   :  { %633 = vmatprep.subr.bf16.mxu0 %v709_v4 }
  0x9b   :  { %656 = vmatpush3.bf16.msra.mxu1 %v700_v62 }
  0x9c   :  { %634 = vmatpush3.bf16.msra.mxu0 %v691_v40  ;;  %661 = vmatprep.subr.bf16.mxu1 %v709_v4 }
  0x9d   :  { %635 = vmatprep.subr.bf16.mxu0 %v709_v4 }
  0xa0   :  { %636 = vmatpush3.bf16.msra.mxu0 %v692_v41 }
  0xa1   :  { %637 = vmatprep.subr.bf16.mxu0 %v709_v4 }
  0xa4   :  { %638 = vmatpush3.bf16.msra.mxu0 %v693_v42 }
  0xa5   :  { %639 = vmatprep.subr.bf16.mxu0 %v709_v4 }
  0xa8   :  { %640 = vmatpush3.bf16.msra.mxu0 %v694_v43 }
  0xa9   :  { %641 = vmatprep.subr.bf16.mxu0 %v709_v4 }
  0xac   :  { %642 = vmatpush3.bf16.msra.mxu0 %v695_v44 }
  0xad   :  { %643 = vmatprep.subr.bf16.mxu0 %v709_v4 }
  0xb0   :  { %644 = vmatpush3.bf16.msra.mxu0 %v696_v45 }
 0x14e   :  { %v232_v48 = vpop.f32.mrf.mxu1 }
 0x150   :  { %v627_v49 = vpop.f32.mrf.mxu1 }
 0x152   :  { %v235_v50 = vpop.f32.mrf.mxu1 }
 0x153   :  { %v163_v51 = vpop.f32.mrf.mxu0 }
 0x154   :  { %v233_v53 = vadd.f32 %v232_v48, %v163_v51  ;;  %v628_v54 = vpop.f32.mrf.mxu1 }
 0x155   :  { %v615_v55 = vpop.f32.mrf.mxu0 }
 0x156   :  { %v245_v56 = vadd.f32 %v561_v52, %v233_v53 }
 0x157   :  { %v166_v57 = vpop.f32.mrf.mxu0 }
 0x158   :  { %v246_v58 = vmax.f32 %v245_v56, 0.0 }
 0x159   :  { %v616_v59 = vpop.f32.mrf.mxu0 }
 0x15a   :  { %v247_v60 = vpack.c.bf16 %v246_v58, %v246_v58 }
 0x15c   :  { %646 = vmatmul.mubr.bf16.vlgmr.msra.gmra.mxu0 %v247_v60 }
 0x21c   :  { %v353_v0 = vpop.f32.mrf.mxu0 }
 0x21d   :  { %v354_v1 = vadd.f32 %v562_v63, %v353_v0 }
 0x21e   :  { %v647_v2 = vpop.f32.mrf.mxu0 }
 0x21f   :  { %v359_v3 = vmax.f32 %v354_v1, 0.0 }
 0x220   :  { %v356_v5 = vpop.f32.mrf.mxu0 }
 0x221   :  { %v360_v7 = vpack.c.bf16 %v359_v3, %v359_v3 }
 0x222   :  { %v648_v8 = vpop.f32.mrf.mxu0 }
 0x223   :  { %658 = vmatmul.mubr.msk.bf16.vlgmr.msra.gmra.mxu1 %vm400_vm12, %v360_v7 }
 0x224   :  { %662 = vmatpush3.bf16.msra.mxu1 %v701_v6  ;;  %665 = vmatprep.mubr.msk.bf16.mxu1 %vm712_vm2, %v709_v4 }
 0x225   :  { %663 = vmatprep.subr.bf16.mxu1 %v709_v4  ;;  %v18_v4 = vstv %s917_s12 }
 0x226   :  { %19 = vst [vmem:[#allocation2] sm:$0x1] %v18_v4 }
 0x228   :  { %664 = vmatpush3.bf16.msra.mxu1 %v702_v9 }
 0x22d   :  { %v582_v28 = vld [vmem:[#allocation2] ss:$0 sm:$0xff] }
 0x2e3   :  { %v438_v11 = vpop.f32.mrf.mxu1 }
 0x2e4   :  { %v439_v12 = vadd.f32 %v571_v10, %v438_v11 }
 0x2e5   :  { %v659_v13 = vpop.f32.mrf.mxu1 }
 0x2e6   :  { %v444_v14 = vmax.f32 %v439_v12, 0.0 }
 0x2e7   :  { %v441_v15 = vpop.f32.mrf.mxu1 }
 0x2e8   :  { %v445_v16 = vpack.c.bf16 %v444_v14, %v444_v14 }
 0x2e9   :  { %v660_v17 = vpop.f32.mrf.mxu1 }
 0x2ea   :  { %666 = vmatmul.mubr.msk.bf16.vlgmr.msra.gmra.mxu1 %vm469_vm13, %v445_v16 }
 0x3aa   :  { %v507_v19 = vpop.f32.mrf.mxu1 }
 0x3ab   :  { %v508_v20 = vadd.f32 %v577_v18, %v507_v19 }
 0x3ac   :  { %v667_v21 = vpop.f32.mrf.mxu1 }
 0x3ad   :  { %v513_v23 = vmax.f32 %v508_v20, 0.0 }
 0x3ae   :  { %v510_v24 = vpop.f32.mrf.mxu1 }
 0x3af   :  { %v521_v25 = vmul.f32 %v581_v22, %v513_v23 }
 0x3b0   :  { %v668_v26 = vpop.f32.mrf.mxu1 }
 0x3b1   :  { %v523_v27 = vsel %vm522_vm14, %v521_v25, 0.0 }
 0x3b2   :  { %524 = vadd.xlane.f32.xlu1 %v523_v27 }
 0x43b   :  { %v525_v29 = vpop.xlane.xlu1 %524 }
 0x43c   :  { %v533_v30 = vadd.f32 %v582_v28, %v525_v29 }
 0x43e   :  { %v583_v31 = vmul.f32 -1.442695, %v533_v30 }
 0x440   :  { %703 = vpow2.f32 %v583_v31 }
 0x44d   :  { %v704_v32 = vpop.eup %703 }
 0x44e   :  { %v537_v33 = vadd.f32 1.0, %v704_v32 }
 0x450   :  { %705 = vrcp.f32 %v537_v33 }
 0x45d   :  { %v706_v34 = vpop.eup %705 }
 0x45e   :  { %541 = vst.msk [vmem:[%s920_s13] sm:$0xff] %vm540_vm15, %v706_v34 }

</bundles_post_ra>
